<compile_context>
chip_gen: v5e
topology: v5e:2x2
jax: 0.10.0
libtpu: 0.0.40
codegen_flags: <defaults>
</compile_context>

<pallas_src>
import functools

import jax
import jax.numpy as jnp
from jax.experimental import pallas as pl
from jax.experimental.pallas import tpu as pltpu

NUM_STATES = 8
HIDDEN_UNITS = 256
NUM_ACTIONS = 4
PAD_N = 128          # lane-dense padded output width (>= NUM_ACTIONS)
MAX_TB = 1024        # batch tile cap


def _round_up(a, m):
    return (a + m - 1) // m * m


def _mlp_kernel(x_ref, w1_ref, b1_ref, w2_ref, b2_ref, o_ref):
    # fc1 + ReLU  (MXU matmul, f32 accumulate; bias add / ReLU on the VPU)
    h = jnp.dot(x_ref[...], w1_ref[...], preferred_element_type=jnp.float32)
    h = jnp.maximum(h + b1_ref[...], 0.0)
    # fc2 into the lane-dense padded output tile (TB, 128)
    out = jnp.dot(h, w2_ref[...], preferred_element_type=jnp.float32)
    o_ref[...] = (out + b2_ref[...]).astype(o_ref.dtype)


@functools.partial(jax.jit, static_argnames=())
def lunar_lander_forward(x, w1, b1, w2, b2):
    """x: (B, 8) f32; w1: (8, 256); b1: (256,); w2: (256, 4); b2: (4,).
    Returns (B, 4) f32 = relu(x @ w1 + b1) @ w2 + b2."""
    B = x.shape[0]

    # ---- wrapper-side layout plumbing (fused under jit, one-time per call) --
    # Zero-pad fc2 weight/bias to a lane-dense 128-wide output column tile.
    w2_pad = jnp.zeros((HIDDEN_UNITS, PAD_N), jnp.float32).at[:, :NUM_ACTIONS].set(w2)
    b2_pad = jnp.zeros((1, PAD_N), jnp.float32).at[:, :NUM_ACTIONS].set(b2)
    b1_2d = b1.reshape(1, HIDDEN_UNITS)

    # Batch tile: multiple of 8 sublanes, capped so padded (TB,128) blocks
    # (x lane-padded + out, double-buffered) plus the hidden scratch stay well
    # under the default scoped-VMEM limit.
    TB = min(MAX_TB, _round_up(B, 8))
    padded_B = _round_up(B, TB)
    if padded_B != B:
        x = jnp.pad(x, ((0, padded_B - B), (0, 0)))

    grid = (padded_B // TB,)

    out_padded = pl.pallas_call(
        _mlp_kernel,
        out_shape=jax.ShapeDtypeStruct((padded_B, PAD_N), jnp.float32),
        grid=grid,
        in_specs=[
            # x: streamed per batch tile (double-buffered by the pipeline)
            pl.BlockSpec((TB, NUM_STATES), lambda i: (i, 0)),
            # weights / biases: tiny, DMA'd once (constant index_maps)
            pl.BlockSpec((NUM_STATES, HIDDEN_UNITS), lambda i: (0, 0)),
            pl.BlockSpec((1, HIDDEN_UNITS), lambda i: (0, 0)),
            pl.BlockSpec((HIDDEN_UNITS, PAD_N), lambda i: (0, 0)),
            pl.BlockSpec((1, PAD_N), lambda i: (0, 0)),
        ],
        out_specs=pl.BlockSpec((TB, PAD_N), lambda i: (i, 0)),
        compiler_params=pltpu.CompilerParams(
            dimension_semantics=("parallel",),
        ),
    )(x, w1, b1_2d, w2_pad, b2_pad)

    # Drop batch padding and the lane padding on the output.
    return out_padded[:B, :NUM_ACTIONS]


def init_params(key):
    """Deterministic init mimicking PyTorch nn.Linear defaults:
    U(-1/sqrt(fan_in), 1/sqrt(fan_in)) for both weights and biases.
    Weights stored as (in_features, out_features) so the kernel does x @ W + b."""
    k1, k2, k3, k4 = jax.random.split(key, 4)
    bound1 = 1.0 / jnp.sqrt(jnp.float32(NUM_STATES))
    bound2 = 1.0 / jnp.sqrt(jnp.float32(HIDDEN_UNITS))
    w1 = jax.random.uniform(k1, (NUM_STATES, HIDDEN_UNITS), jnp.float32,
                            -bound1, bound1)
    b1 = jax.random.uniform(k2, (HIDDEN_UNITS,), jnp.float32, -bound1, bound1)
    w2 = jax.random.uniform(k3, (HIDDEN_UNITS, NUM_ACTIONS), jnp.float32,
                            -bound2, bound2)
    b2 = jax.random.uniform(k4, (NUM_ACTIONS,), jnp.float32, -bound2, bound2)
    return w1, b1, w2, b2


if __name__ == "__main__":
    key = jax.random.PRNGKey(0)
    k_params, k_x1, k_x2 = jax.random.split(key, 3)

    w1, b1, w2, b2 = init_params(k_params)

    # Small case (like an RL actor step): batch = 2
    batch = 2
    x = jax.random.normal(k_x1, (batch, NUM_STATES), jnp.float32)
    out = jax.block_until_ready(lunar_lander_forward(x, w1, b1, w2, b2))
    ref = jnp.maximum(x @ w1 + b1, 0.0) @ w2 + b2
    assert out.shape == (batch, NUM_ACTIONS)
    assert jnp.allclose(out, ref, atol=1e-5, rtol=1e-5)

    # Larger, non-tile-aligned batch to exercise the batch grid + padding path
    batch2 = 1500
    x2 = jax.random.normal(k_x2, (batch2, NUM_STATES), jnp.float32)
    out2 = jax.block_until_ready(lunar_lander_forward(x2, w1, b1, w2, b2))
    ref2 = jnp.maximum(x2 @ w1 + b1, 0.0) @ w2 + b2
    assert out2.shape == (batch2, NUM_ACTIONS)
    assert jnp.allclose(out2, ref2, atol=1e-4, rtol=1e-4)

    print("KERNEL_OK")
</pallas_src>

<mosaic_0001>
module attributes {stable_mosaic.version = 11 : i64} {
  func.func @_mlp_kernel(%arg0: i32, %arg1: memref<8x8xf32, #tpu.memory_space<vmem>>, %arg2: memref<8x256xf32, #tpu.memory_space<vmem>>, %arg3: memref<1x256xf32, #tpu.memory_space<vmem>>, %arg4: memref<256x128xf32, #tpu.memory_space<vmem>>, %arg5: memref<1x128xf32, #tpu.memory_space<vmem>>, %arg6: memref<8x128xf32, #tpu.memory_space<vmem>>) attributes {dimension_semantics = [#tpu.dimension_semantics<parallel>], iteration_bounds = array<i64: 1>, scalar_prefetch = 0 : i64, scratch_operands = 0 : i64, tpu.core_type = #tpu.core_type<tc>, window_params = [{transform_indices = @transform_0, window_bounds = array<i64: 8, 8>}, {pipeline_mode = #tpu.pipeline_mode<synchronous>, transform_indices = @transform_1, window_bounds = array<i64: 8, 256>}, {pipeline_mode = #tpu.pipeline_mode<synchronous>, transform_indices = @transform_2, window_bounds = array<i64: 1, 256>}, {pipeline_mode = #tpu.pipeline_mode<synchronous>, transform_indices = @transform_3, window_bounds = array<i64: 256, 128>}, {pipeline_mode = #tpu.pipeline_mode<synchronous>, transform_indices = @transform_4, window_bounds = array<i64: 1, 128>}, {transform_indices = @transform_5, window_bounds = array<i64: 8, 128>}]} {
    %c0 = arith.constant 0 : index
    %c0_0 = arith.constant 0 : index
    %0 = vector.load %arg1[%c0, %c0_0] : memref<8x8xf32, #tpu.memory_space<vmem>>, vector<8x8xf32>
    %c0_1 = arith.constant 0 : index
    %c0_2 = arith.constant 0 : index
    %1 = vector.load %arg2[%c0_1, %c0_2] : memref<8x256xf32, #tpu.memory_space<vmem>>, vector<8x256xf32>
    %cst = arith.constant dense<0.000000e+00> : vector<8x256xf32>
    %2 = tpu.matmul %0, %1, %cst {dimension_numbers = #tpu.dot_dimension_numbers<[1], [0], [0], [1], [0, 0, 1, 1], [], []>} : vector<8x8xf32>, vector<8x256xf32>, vector<8x256xf32> -> vector<8x256xf32>
    %c0_3 = arith.constant 0 : index
    %c0_4 = arith.constant 0 : index
    %3 = vector.load %arg3[%c0_3, %c0_4] : memref<1x256xf32, #tpu.memory_space<vmem>>, vector<1x256xf32>
    %4 = vector.broadcast %3 : vector<1x256xf32> to vector<8x256xf32>
    %5 = arith.addf %2, %4 : vector<8x256xf32>
    %cst_5 = arith.constant 0.000000e+00 : f32
    %6 = vector.broadcast %cst_5 : f32 to vector<8x256xf32>
    %7 = arith.maximumf %5, %6 : vector<8x256xf32>
    %c0_6 = arith.constant 0 : index
    %c0_7 = arith.constant 0 : index
    %8 = vector.load %arg4[%c0_6, %c0_7] : memref<256x128xf32, #tpu.memory_space<vmem>>, vector<256x128xf32>
    %cst_8 = arith.constant dense<0.000000e+00> : vector<8x128xf32>
    %9 = tpu.matmul %7, %8, %cst_8 {dimension_numbers = #tpu.dot_dimension_numbers<[1], [0], [0], [1], [0, 0, 1, 1], [], []>} : vector<8x256xf32>, vector<256x128xf32>, vector<8x128xf32> -> vector<8x128xf32>
    %c0_9 = arith.constant 0 : index
    %c0_10 = arith.constant 0 : index
    %10 = vector.load %arg5[%c0_9, %c0_10] : memref<1x128xf32, #tpu.memory_space<vmem>>, vector<1x128xf32>
    %11 = vector.broadcast %10 : vector<1x128xf32> to vector<8x128xf32>
    %12 = arith.addf %9, %11 : vector<8x128xf32>
    %c0_11 = arith.constant 0 : index
    %c0_12 = arith.constant 0 : index
    %13 = vector.load %arg6[%c0_11, %c0_12] : memref<8x128xf32, #tpu.memory_space<vmem>>, vector<8x128xf32>
    tpu.vector_store %arg6[%c0_11, %c0_12], %12 {strides = array<i32>} : memref<8x128xf32, #tpu.memory_space<vmem>>, vector<8x128xf32>,
    return
  }
  func.func @transform_0(%arg0: i32) -> (i32, i32) {
    %c0_i32 = arith.constant 0 : i32
    %c0_i32_0 = arith.constant 0 : i32
    return %arg0, %c0_i32 : i32, i32
  }
  func.func @transform_1(%arg0: i32) -> (i32, i32) {
    %c0_i32 = arith.constant 0 : i32
    %c0_i32_0 = arith.constant 0 : i32
    %c0_i32_1 = arith.constant 0 : i32
    return %c0_i32, %c0_i32_0 : i32, i32
  }
  func.func @transform_2(%arg0: i32) -> (i32, i32) {
    %c0_i32 = arith.constant 0 : i32
    %c0_i32_0 = arith.constant 0 : i32
    %c0_i32_1 = arith.constant 0 : i32
    return %c0_i32, %c0_i32_0 : i32, i32
  }
  func.func @transform_3(%arg0: i32) -> (i32, i32) {
    %c0_i32 = arith.constant 0 : i32
    %c0_i32_0 = arith.constant 0 : i32
    %c0_i32_1 = arith.constant 0 : i32
    return %c0_i32, %c0_i32_0 : i32, i32
  }
  func.func @transform_4(%arg0: i32) -> (i32, i32) {
    %c0_i32 = arith.constant 0 : i32
    %c0_i32_0 = arith.constant 0 : i32
    %c0_i32_1 = arith.constant 0 : i32
    return %c0_i32, %c0_i32_0 : i32, i32
  }
  func.func @transform_5(%arg0: i32) -> (i32, i32) {
    %c0_i32 = arith.constant 0 : i32
    %c0_i32_0 = arith.constant 0 : i32
    return %arg0, %c0_i32 : i32, i32
  }
}

</mosaic_0001>

<bundles_post_ra>
// kernel: lunar_lander_forward.1
= control target key start
LH: loop header
LB: loop body
LE: loop exit
PB: predicated region body
PF: predicated region fallthrough
CT: control target
= control target key end

     0   :  { %vm29_vm0 = vcmask 64512   ;;  %s303_s1 = inlined_call_operand.vmem [shape: f32[8,256], index: 1, kind: input, shape index: {}]   ;;  %s304_s0 = inlined_call_operand.vmem [shape: f32[8,8], index: 0, kind: input, shape index: {}]   ;;  %s305_s3 = inlined_call_operand.vmem [shape: f32[256,128], index: 3, kind: input, shape index: {}]   ;;  %s306_s4 = inlined_call_operand.vmem [shape: f32[1,128], index: 4, kind: input, shape index: {}]   ;;  %s307_s2 = inlined_call_operand.vmem [shape: f32[1,256], index: 2, kind: input, shape index: {}]   ;;  %s308_s5 = inlined_call_operand.vmem [shape: f32[8,128], index: 5, kind: output, shape index: {}]  }
   0x1   :  { %v21_v0 = vld [vmem:[%s303_s1] sm:$0xff]  ;;  %v22_v2 = vld [vmem:[%s303_s1 + $0x8] sm:$0xff]  ;;  %v90_v3 = vld [vmem:[%s305_s3 + $0x78] sm:$0xff] }
   0x2   :  { %v20_v1 = vld [vmem:[%s304_s0] sm:$0xff]  ;;  %48 = vmatpush.msra.mxu0 %v21_v0  ;;  %68 = vmatpush.msra.mxu1 %v22_v2  ;;  %v106_v4 = vld [vmem:[%s305_s3 + $0xf8] sm:$0xff]  ;;  %v89_v5 = vld [vmem:[%s305_s3 + $0x70] sm:$0xff] }
   0x3   :  { %156 = vmatmul.msk.f32.vlgmr.msra.gmra.mxu0 %vm29_vm0, %v20_v1  ;;  %157 = vmatmul.msk.f32.vlgmr.msra.gmra.mxu1 %vm29_vm0, %v20_v1  ;;  %v105_v6 = vld [vmem:[%s305_s3 + $0xf0] sm:$0xff]  ;;  %v88_v7 = vld [vmem:[%s305_s3 + $0x68] sm:$0xff]  ;;  %v87_v9 = vld [vmem:[%s305_s3 + $0x60] sm:$0xff] }
   0x4   :  { %111 = vmatpush.msra.mxu2 %v90_v3  ;;  %131 = vmatpush.msra.mxu3 %v106_v4  ;;  %v104_v8 = vld [vmem:[%s305_s3 + $0xe8] sm:$0xff]  ;;  %v103_v10 = vld [vmem:[%s305_s3 + $0xe0] sm:$0xff]  ;;  %v86_v11 = vld [vmem:[%s305_s3 + $0x58] sm:$0xff] }
   0x5   :  { %v102_v12 = vld [vmem:[%s305_s3 + $0xd8] sm:$0xff]  ;;  %v85_v13 = vld [vmem:[%s305_s3 + $0x50] sm:$0xff]  ;;  %v84_v15 = vld [vmem:[%s305_s3 + $0x48] sm:$0xff] }
   0x6   :  { %112 = vmatpush.msra.mxu2 %v89_v5  ;;  %132 = vmatpush.msra.mxu3 %v105_v6  ;;  %v101_v14 = vld [vmem:[%s305_s3 + $0xd0] sm:$0xff]  ;;  %v100_v16 = vld [vmem:[%s305_s3 + $0xc8] sm:$0xff]  ;;  %v83_v17 = vld [vmem:[%s305_s3 + $0x40] sm:$0xff] }
   0x7   :  { %v99_v18 = vld [vmem:[%s305_s3 + $0xc0] sm:$0xff]  ;;  %v82_v19 = vld [vmem:[%s305_s3 + $0x38] sm:$0xff]  ;;  %v81_v21 = vld [vmem:[%s305_s3 + $0x30] sm:$0xff] }
   0x8   :  { %113 = vmatpush.msra.mxu2 %v88_v7  ;;  %133 = vmatpush.msra.mxu3 %v104_v8  ;;  %v98_v20 = vld [vmem:[%s305_s3 + $0xb8] sm:$0xff]  ;;  %v97_v22 = vld [vmem:[%s305_s3 + $0xb0] sm:$0xff]  ;;  %v80_v23 = vld [vmem:[%s305_s3 + $0x28] sm:$0xff] }
   0x9   :  { %v96_v24 = vld [vmem:[%s305_s3 + $0xa8] sm:$0xff]  ;;  %v79_v25 = vld [vmem:[%s305_s3 + $0x20] sm:$0xff]  ;;  %v78_v27 = vld [vmem:[%s305_s3 + $0x18] sm:$0xff] }
   0xa   :  { %114 = vmatpush.msra.mxu2 %v87_v9  ;;  %134 = vmatpush.msra.mxu3 %v103_v10  ;;  %v95_v26 = vld [vmem:[%s305_s3 + $0xa0] sm:$0xff]  ;;  %v77_v28 = vld [vmem:[%s305_s3 + $0x10] sm:$0xff]  ;;  %v94_v29 = vld [vmem:[%s305_s3 + $0x98] sm:$0xff] }
   0xb   :  { %v76_v30 = vld [vmem:[%s305_s3 + $0x8] sm:$0xff]  ;;  %v93_v31 = vld [vmem:[%s305_s3 + $0x90] sm:$0xff]  ;;  %v75_v32 = vld [vmem:[%s305_s3] sm:$0xff] }
   0xc   :  { %115 = vmatpush.msra.mxu2 %v86_v11  ;;  %135 = vmatpush.msra.mxu3 %v102_v12  ;;  %v92_v33 = vld [vmem:[%s305_s3 + $0x88] sm:$0xff]  ;;  %v91_v34 = vld [vmem:[%s305_s3 + $0x80] sm:$0xff] }
   0xd   :  { %v23_v35 = vld [vmem:[%s307_s2] sm:$0x3] }
   0xe   :  { %116 = vmatpush.msra.mxu2 %v85_v13  ;;  %136 = vmatpush.msra.mxu3 %v101_v14  ;;  %v25_v36 = vperm.slane %v23_v35, 0  ;;  %v26_v37 = vperm.slane %v23_v35, 1  ;;  %v158_v44 = vld [vmem:[%s306_s4] ss:$0 sm:$0xff] }
  0x10   :  { %117 = vmatpush.msra.mxu2 %v84_v15  ;;  %137 = vmatpush.msra.mxu3 %v100_v16 }
  0x12   :  { %118 = vmatpush.msra.mxu2 %v83_v17  ;;  %138 = vmatpush.msra.mxu3 %v99_v18 }
  0x14   :  { %119 = vmatpush.msra.mxu2 %v82_v19  ;;  %139 = vmatpush.msra.mxu3 %v98_v20 }
  0x16   :  { %120 = vmatpush.msra.mxu2 %v81_v21  ;;  %140 = vmatpush.msra.mxu3 %v97_v22 }
  0x18   :  { %121 = vmatpush.msra.mxu2 %v80_v23  ;;  %141 = vmatpush.msra.mxu3 %v96_v24 }
  0x1a   :  { %122 = vmatpush.msra.mxu2 %v79_v25  ;;  %142 = vmatpush.msra.mxu3 %v95_v26 }
  0x1c   :  { %123 = vmatpush.msra.mxu2 %v78_v27  ;;  %143 = vmatpush.msra.mxu3 %v94_v29 }
  0x1e   :  { %124 = vmatpush.msra.mxu2 %v77_v28  ;;  %144 = vmatpush.msra.mxu3 %v93_v31 }
  0x20   :  { %125 = vmatpush.msra.mxu2 %v76_v30  ;;  %145 = vmatpush.msra.mxu3 %v92_v33 }
  0x22   :  { %126 = vmatpush.msra.mxu2 %v75_v32  ;;  %146 = vmatpush.msra.mxu3 %v91_v34 }
  0x80   :  { %v50_v38 = vpop.f32.mrf.mxu0  ;;  %v70_v39 = vpop.f32.mrf.mxu1 }
  0x81   :  { %v51_v40 = vadd.f32 %v50_v38, %v25_v36  ;;  %v71_v41 = vadd.f32 %v70_v39, %v26_v37 }
  0x83   :  { %v73_v42 = vmax.f32 %v51_v40, 0.0  ;;  %v74_v43 = vmax.f32 %v71_v41, 0.0 }
  0x85   :  { %127 = vmatmul.f32.vlgmr.msra.gmra.mxu2 %v73_v42  ;;  %147 = vmatmul.f32.vlgmr.msra.gmra.mxu3 %v74_v43 }
 0x108   :  { %v128_v45 = vpop.f32.mrf.mxu2  ;;  %v148_v46 = vpop.f32.mrf.mxu3 }
 0x109   :  { %v129_v47 = vadd.f32 %v158_v44, %v128_v45 }
 0x10b   :  { %v149_v48 = vadd.f32 %v148_v46, %v129_v47 }
 0x10d   :  { %151 = vst [vmem:[%s308_s5] sm:$0xff] %v149_v48 }

</bundles_post_ra>
